<compile_context>
chip_gen: v7x
topology: tpu7x:2x2x1
jax: 0.10.0
libtpu: 0.0.40
codegen_flags: <defaults>
</compile_context>

<pallas_src>
import functools
import math

import jax
import jax.numpy as jnp
import numpy as np
from jax.experimental import pallas as pl
from jax.experimental.pallas import tpu as pltpu


_LANE = 128
_SUBLANE = 8
_MIB = 1024 * 1024
# Resident-table path must fit comfortably in VMEM on v7x (64 MiB per core).
_RESIDENT_VMEM_BUDGET = 40 * _MIB


def _round_up(x, m):
    return (x + m - 1) // m * m


def _default_block_rows():
    # v5e's MXU is 4x(128x128): M=128 already fills it, and 256-row tiles only
    # double the one-hot working set. v6e/v7x MXUs are 256 wide.
    try:
        kind = jax.devices()[0].device_kind.lower()
    except Exception:
        return 256
    if "v5 lite" in kind or "v5e" in kind or "v5lite" in kind:
        return 128
    return 256


def _embedding_padded_kernel(idx_ref, emb_ref, out_ref, *, padding_idx):
    # idx_ref: (block_rows, 1) int32 -- per-step token tile (double buffered,
    #          O(block_rows) VMEM, not the whole index array).
    # emb_ref: (v_pad, D) table, whole array resident in VMEM (single copy).
    # out_ref: (block_rows, D) output tile, last dim unpadded (full array dim).
    idx = idx_ref[...]                                           # (bn, 1)

    # Remap padding ids to -1 so their one-hot row is all zeros -- identical to
    # gathering from the padding-zeroed table. Out-of-range ids also yield
    # zero rows (PyTorch would raise; documented difference).
    sel = jnp.where(idx == padding_idx, jnp.int32(-1), idx)      # (bn, 1)

    bn = idx.shape[0]
    v_pad = emb_ref.shape[0]
    # Lane-dim iota is cheap to materialize; the compare broadcasts the sel
    # column across lanes, which is negligible next to the matmul / HBM writes.
    iota_v = jax.lax.broadcasted_iota(jnp.int32, (bn, v_pad), 1)
    onehot = jnp.where(iota_v == sel, 1.0, 0.0).astype(emb_ref.dtype)

    # TODO(synk): for very large vocabularies a bf16 cast of onehot/table (with
    # f32 accumulate) would unlock 4-8x MXU rate; opt-in only (rounds weights).
    out_ref[...] = jnp.dot(
        onehot, emb_ref[...], preferred_element_type=jnp.float32
    ).astype(out_ref.dtype)


def _xla_embedding_padded(idx, embeddings, padding_idx):
    zeroed = embeddings.at[padding_idx].set(0.0)
    return jnp.take(zeroed, idx, axis=0)


def embedding_padded(idx, embeddings, padding_idx, *, block_rows=None,
                     allow_xla_small_fast_path=False):
    """EmbeddingPadded.forward.

    idx: integer array of any shape; embeddings: [V, D] float table.
    Returns idx.shape + (D,) with the padding row zeroed before the gather.
    """
    V, D = embeddings.shape
    # PyTorch accepts negative padding_idx (e.g. -1 meaning row V-1).
    padding_idx = int(padding_idx) % V

    idx_shape = tuple(idx.shape)
    N = int(np.prod(idx_shape)) if idx_shape else 1

    if block_rows is None:
        block_rows = _default_block_rows()
    block_rows = max(_SUBLANE, min(block_rows, _round_up(N, _SUBLANE)))
    n_pad = _round_up(N, block_rows)
    n_tiles = n_pad // block_rows
    v_pad = _round_up(V, _LANE)           # lane-dense one-hot contraction dim
    d_lanes = _round_up(D, _LANE)         # VMEM lane footprint of a D-wide row

    # --- per-core VMEM accounting for the resident-table one-hot path ---
    table_vmem = v_pad * d_lanes * 4              # single resident copy
    idx_vmem = 2 * block_rows * _LANE * 4         # double-buffered token tile
    out_vmem = 2 * block_rows * d_lanes * 4       # double-buffered output tile
    onehot_vmem = 2 * block_rows * v_pad * 4      # iota + one-hot temporaries
    vmem_need = table_vmem + idx_vmem + out_vmem + onehot_vmem

    use_pallas = vmem_need <= _RESIDENT_VMEM_BUDGET
    if allow_xla_small_fast_path and N * d_lanes * 4 < 256 * 1024:
        # Tiny problems: pallas_call fixed cost dwarfs the useful work.
        use_pallas = False
    if not use_pallas:
        # TODO(synk): replace this XLA fallback for large vocabularies with a
        # Pallas HBM-gather kernel (indices scalar-prefetched into SMEM, table
        # left in memory_space=pl.ANY, double-buffered make_async_copy row
        # gather, padding row zeroed under pl.when) so only N*D*4 bytes move.
        out = _xla_embedding_padded(idx, embeddings, padding_idx)
        return out.reshape(idx_shape + (D,))

    idx_flat = idx.reshape(N).astype(jnp.int32)
    if n_pad != N:
        # Padded rows select the padding id -> exact zero rows, sliced off
        # below. This costs an extra (n_pad - N)-row HBM write plus an XLA
        # slice copy of the useful rows; block_rows is capped at
        # round_up(N, 8) so the waste stays < one tile.
        idx_flat = jnp.pad(idx_flat, (0, n_pad - N), constant_values=padding_idx)
    idx2d = idx_flat.reshape(n_pad, 1)

    emb = embeddings
    if v_pad != V:
        # Zero rows: never selected. D is intentionally NOT padded -- the
        # output block's last dim is the full array dim (exempt from the 128
        # rule), so only the useful D columns are written to HBM.
        emb = jnp.pad(embeddings, ((0, v_pad - V), (0, 0)))

    kernel = functools.partial(_embedding_padded_kernel, padding_idx=padding_idx)

    out = pl.pallas_call(
        kernel,
        out_shape=jax.ShapeDtypeStruct((n_pad, D), embeddings.dtype),
        grid_spec=pltpu.PrefetchScalarGridSpec(
            num_scalar_prefetch=0,
            grid=(n_tiles,),
            in_specs=[
                # Per-step token tile: O(block_rows) VMEM per buffer.
                pl.BlockSpec((block_rows, 1), lambda i: (i, 0)),
                # Whole (V-padded) table resident in VMEM: ONE copy, one DMA,
                # no double buffering.
                pl.BlockSpec(memory_space=pltpu.MemorySpace.VMEM),
            ],
            out_specs=pl.BlockSpec((block_rows, D), lambda i: (i, 0)),
        ),
        compiler_params=pltpu.CompilerParams(
            # Megacore sharding only pays off with enough tiles per core; with
            # a short grid a second core would just duplicate the table copy.
            dimension_semantics=(("parallel",) if n_tiles >= 8
                                 else ("arbitrary",)),
            # Size-aware request (v7x has only 64 MiB VMEM per core).
            vmem_limit_bytes=int(min(max(vmem_need + 4 * _MIB, 16 * _MIB),
                                     48 * _MIB)),
        ),
    )(idx2d, emb)

    if n_pad != N:
        out = out[:N]
    return out.reshape(idx_shape + (D,))


def initialize_embeddings(key, shape):
    assert len(shape) == 2, "Can only initialize 2-D embedding matrices ..."
    return jax.random.normal(key, shape, dtype=jnp.float32) * math.sqrt(2.0 / shape[1])


def _reference(idx, embeddings, padding_idx):
    # Pure-JAX reference of the PyTorch forward.
    padding_mult = jnp.ones((embeddings.shape[0], 1), dtype=embeddings.dtype)
    padding_mult = padding_mult.at[padding_idx].set(0.0)
    return (embeddings * padding_mult)[idx]


if __name__ == "__main__":
    num_embeddings = 10   # V
    embedding_dim = 32    # D
    padding_idx = 0

    key = jax.random.PRNGKey(0)
    k_emb, k_idx1, k_idx2 = jax.random.split(key, 3)

    embeddings = initialize_embeddings(k_emb, (num_embeddings, embedding_dim))

    # Case 1: small shape typical of the module's forward (B=2, T=8).
    B, T = 2, 8
    idx = jax.random.randint(k_idx1, (B, T), 0, num_embeddings, dtype=jnp.int32)
    idx = idx.at[0, 0].set(padding_idx)
    idx = idx.at[1, 3].set(padding_idx)

    out = jax.block_until_ready(embedding_padded(idx, embeddings, padding_idx))
    ref = _reference(idx, embeddings, padding_idx)
    assert out.shape == (B, T, embedding_dim)
    assert out.dtype == jnp.float32
    np.testing.assert_allclose(np.asarray(out), np.asarray(ref), rtol=1e-6, atol=1e-6)

    # Case 2: ragged N (B*T not a multiple of block_rows) exercising the
    # multi-tile grid and the N / V padding paths.
    B2, T2 = 3, 100
    idx2 = jax.random.randint(k_idx2, (B2, T2), 0, num_embeddings, dtype=jnp.int32)
    idx2 = idx2.at[2, 99].set(padding_idx)

    out2 = jax.block_until_ready(embedding_padded(idx2, embeddings, padding_idx))
    ref2 = _reference(idx2, embeddings, padding_idx)
    np.testing.assert_allclose(np.asarray(out2), np.asarray(ref2), rtol=1e-6, atol=1e-6)

    # Case 3: negative padding_idx (PyTorch allows -1 == last row).
    out3 = jax.block_until_ready(embedding_padded(idx, embeddings, -1))
    ref3 = _reference(idx, embeddings, num_embeddings - 1)
    np.testing.assert_allclose(np.asarray(out3), np.asarray(ref3), rtol=1e-6, atol=1e-6)

    print("KERNEL_OK")
</pallas_src>

<mosaic_0001>
module attributes {stable_mosaic.version = 11 : i64} {
  func.func @_embedding_padded_kernel(%arg0: i32, %arg1: memref<16x1xi32, #tpu.memory_space<vmem>>, %arg2: memref<128x32xf32, #tpu.memory_space<vmem>>, %arg3: memref<16x32xf32, #tpu.memory_space<vmem>>) attributes {dimension_semantics = [#tpu.dimension_semantics<arbitrary>], iteration_bounds = array<i64: 1>, scalar_prefetch = 0 : i64, scratch_operands = 0 : i64, tpu.core_type = #tpu.core_type<tc>, window_params = [{transform_indices = @transform_0, window_bounds = array<i64: 16, 1>}, {pipeline_mode = #tpu.pipeline_mode<synchronous>, transform_indices = @transform_1, window_bounds = array<i64: 128, 32>}, {transform_indices = @transform_2, window_bounds = array<i64: 16, 32>}]} {
    %c0 = arith.constant 0 : index
    %c0_0 = arith.constant 0 : index
    %0 = vector.load %arg1[%c0, %c0_0] : memref<16x1xi32, #tpu.memory_space<vmem>>, vector<16x1xi32>
    %c0_i32 = arith.constant 0 : i32
    %1 = vector.broadcast %c0_i32 : i32 to vector<16x1xi32>
    %2 = arith.cmpi eq, %0, %1 : vector<16x1xi32>
    %c-1_i32 = arith.constant -1 : i32
    %3 = vector.broadcast %c-1_i32 : i32 to vector<16x1xi32>
    %4 = arith.select %2, %3, %0 : vector<16x1xi1>, vector<16x1xi32>
    %5 = tpu.iota {dimensions = array<i32: 1>} : vector<16x128xi32>
    %6 = vector.broadcast %4 : vector<16x1xi32> to vector<16x128xi32>
    %7 = arith.cmpi eq, %5, %6 : vector<16x128xi32>
    %cst = arith.constant 1.000000e+00 : f32
    %cst_1 = arith.constant 0.000000e+00 : f32
    %8 = vector.broadcast %cst : f32 to vector<16x128xf32>
    %9 = vector.broadcast %cst_1 : f32 to vector<16x128xf32>
    %10 = arith.select %7, %8, %9 : vector<16x128xi1>, vector<16x128xf32>
    %c0_2 = arith.constant 0 : index
    %c0_3 = arith.constant 0 : index
    %11 = vector.load %arg2[%c0_2, %c0_3] : memref<128x32xf32, #tpu.memory_space<vmem>>, vector<128x32xf32>
    %cst_4 = arith.constant dense<0.000000e+00> : vector<16x32xf32>
    %12 = tpu.matmul %10, %11, %cst_4 {dimension_numbers = #tpu.dot_dimension_numbers<[1], [0], [0], [1], [0, 0, 1, 1], [], []>} : vector<16x128xf32>, vector<128x32xf32>, vector<16x32xf32> -> vector<16x32xf32>
    %c0_5 = arith.constant 0 : index
    %c0_6 = arith.constant 0 : index
    %13 = vector.load %arg3[%c0_5, %c0_6] : memref<16x32xf32, #tpu.memory_space<vmem>>, vector<16x32xf32>
    tpu.vector_store %arg3[%c0_5, %c0_6], %12 {strides = array<i32>} : memref<16x32xf32, #tpu.memory_space<vmem>>, vector<16x32xf32>,
    return
  }
  func.func @transform_0(%arg0: i32) -> (i32, i32) {
    %c0_i32 = arith.constant 0 : i32
    %c0_i32_0 = arith.constant 0 : i32
    return %arg0, %c0_i32 : i32, i32
  }
  func.func @transform_1(%arg0: i32) -> (i32, i32) {
    %c0_i32 = arith.constant 0 : i32
    %c0_i32_0 = arith.constant 0 : i32
    %c0_i32_1 = arith.constant 0 : i32
    return %c0_i32, %c0_i32_0 : i32, i32
  }
  func.func @transform_2(%arg0: i32) -> (i32, i32) {
    %c0_i32 = arith.constant 0 : i32
    %c0_i32_0 = arith.constant 0 : i32
    return %arg0, %c0_i32 : i32, i32
  }
}

</mosaic_0001>

<bundles_post_ra>
// kernel: tpu_custom_call.1
= control target key start
LH: loop header
LB: loop body
LE: loop exit
PB: predicated region body
PF: predicated region fallthrough
CT: control target
= control target key end

     0   :  { %v257_v3 = vmov 0   ;;  %s343_s0 = inlined_call_operand.vmem [shape: s32[16,1], index: 0, kind: input, shape index: {}]   ;;  %s344_s1 = inlined_call_operand.vmem [shape: f32[128,32], index: 1, kind: input, shape index: {}]   ;;  %s345_s2 = inlined_call_operand.hbm [shape: f32[16,32], index: 2, kind: output, shape index: {}]  }
   0x1   :  { %v12_v0 = vld [vmem:[%s343_s0] sm:$0xff]  ;;  %v13_v1 = vld [vmem:[%s343_s0 + $0x8] sm:$0xff]  ;;  %232 = vset.pattern.permute.xlu0 %v257_v3  ;;  %v32_v5 = vld [vmem:[%s344_s1 + $0x10] sm:$0xff] }
   0x2   :  { %v30_v2 = vld [vmem:[%s344_s1] sm:$0xff]  ;;  %vm14_vm0 = vcmp.eq.s32.totalorder %v12_v0, 0  ;;  %vm15_vm1 = vcmp.eq.s32.totalorder %v13_v1, 0  ;;  %v31_v4 = vld [vmem:[%s344_s1 + $0x8] sm:$0xff]  ;;  %v33_v6 = vld [vmem:[%s344_s1 + $0x18] sm:$0xff] }
   0x3   :  { %v16_v7 = vsel %vm14_vm0, 4294967295, %v12_v0  ;;  %v195_v8 = vpack.c.bf16 %v31_v4, %v30_v2  ;;  %v199_v9 = vpack.c.bf16 %v33_v6, %v32_v5  ;;  %v34_v10 = vld [vmem:[%s344_s1 + $0x20] sm:$0xff]  ;;  %v35_v11 = vld [vmem:[%s344_s1 + $0x28] sm:$0xff]  ;;  %v17_v12 = vsel %vm15_vm1, 4294967295, %v13_v1 }
   0x4   :  { %21 = vperm.xlu0 %232, %v16_v7   ;;  %v203_v13 = vpack.c.bf16 %v35_v11, %v34_v10 }
   0x5   :  { %196 = vmatprep.subr.bf16.mxu0 %v195_v8 }
   0x6   :  { %198 = vmatpush3.bf16.msra.mxu0 %v195_v8 }
   0x7   :  { %200 = vmatprep.subr.bf16.mxu0 %v199_v9 }
   0x8   :  { %7 = vsyncpa [#allocation3], 0  ;;  %24 = vperm.xlu0 %232, %v17_v12   ;;  %v36_v14 = vld [vmem:[%s344_s1 + $0x30] sm:$0xff]  ;;  %v37_v15 = vld [vmem:[%s344_s1 + $0x38] sm:$0xff]  ;;  %v18_v29 = vlaneseq  ;;  %v258_v32 = vmov 1.0   ;;  %s259_s16 = smov [#allocation2]  }
   0x9   :  { %v207_v16 = vpack.c.bf16 %v37_v15, %v36_v14  ;;  %v38_v17 = vld [vmem:[%s344_s1 + $0x40] sm:$0xff]  ;;  %v39_v18 = vld [vmem:[%s344_s1 + $0x48] sm:$0xff]  ;;  %v40_v20 = vld [vmem:[%s344_s1 + $0x50] sm:$0xff]  ;;  %s129_s17 = sshll.u32 %s259_s16, 4  ;;  %vm121_vm4 = vcmask 261120   ;;  %s130_s17 = int_to_ptr.vmem [resolvable:$true] %s129_s17 }
   0xa   :  { %202 = vmatpush3.bf16.msra.mxu0 %v199_v9  ;;  %v211_v19 = vpack.c.bf16 %v39_v18, %v38_v17  ;;  %v41_v21 = vld [vmem:[%s344_s1 + $0x58] sm:$0xff]  ;;  %v42_v23 = vld [vmem:[%s344_s1 + $0x60] sm:$0xff]  ;;  %v43_v24 = vld [vmem:[%s344_s1 + $0x68] sm:$0xff]  ;;  %v19_v30 = vand.u32 127, %v18_v29  ;;  %p238_p1 = scmp.lt.s32.totalorder %s130_s17, %s130_s17 }
   0xb   :  { %204 = vmatprep.subr.bf16.mxu0 %v203_v13  ;;  %v215_v22 = vpack.c.bf16 %v41_v21, %v40_v20  ;;  %v219_v25 = vpack.c.bf16 %v43_v24, %v42_v23  ;;  %v44_v26 = vld [vmem:[%s344_s1 + $0x70] sm:$0xff]  ;;  %v45_v27 = vld [vmem:[%s344_s1 + $0x78] sm:$0xff]  ;;  %s233_s1 = scalar_lea.vmem %s130_s17, 256 }
   0xc   :  { %v223_v28 = vpack.c.bf16 %v45_v27, %v44_v26  ;;  %p234_p0 = scmp.ne.s32.totalorder %s130_s17, %s233_s1  ;;  %p239_p2 = scmp.lt.s32.totalorder %s233_s1, %s233_s1 }
   0xe   :  { %206 = vmatpush3.bf16.msra.mxu0 %v203_v13  ;;  %p240_p3 = por %p239_p2, %p238_p1 }
   0xf   :  { %208 = vmatprep.subr.bf16.mxu0 %v207_v16 }
  0x10   :  { %p241_p4 = pnand %p240_p3, %p234_p0 }
  0x12   :  { %210 = vmatpush3.bf16.msra.mxu0 %v207_v16 }
  0x13   :  { %212 = vmatprep.subr.bf16.mxu0 %v211_v19 }
  0x16   :  { %214 = vmatpush3.bf16.msra.mxu0 %v211_v19 }
  0x17   :  { %216 = vmatprep.subr.bf16.mxu0 %v215_v22 }
  0x1a   :  { %218 = vmatpush3.bf16.msra.mxu0 %v215_v22 }
  0x1b   :  { %220 = vmatprep.subr.bf16.mxu0 %v219_v25 }
  0x1e   :  { %222 = vmatpush3.bf16.msra.mxu0 %v219_v25 }
  0x1f   :  { %224 = vmatprep.subr.bf16.mxu0 %v223_v28 }
  0x22   :  { %226 = vmatpush3.bf16.msra.mxu0 %v223_v28 }
  0x83   :  { %v22_v31 = vpop.permute.xlu0 %21 }
  0x84   :  { %vm26_vm2 = vcmp.eq.s32.totalorder %v19_v30, %v22_v31 }
  0x85   :  { %192 = vmatprep.mubr.msk.f32.mxu0 %vm26_vm2, %v258_v32 }
  0x87   :  { %v25_v33 = vpop.permute.xlu0 %24 }
  0x88   :  { %vm27_vm3 = vcmp.eq.s32.totalorder %v19_v30, %v25_v33 }
  0x89   :  { %193 = vmatmul.mubr.msk.f32.vlgmr.msra.gmra.mrb[0].mxu0 %vm27_vm3, %v258_v32 }
 0x15c   :  { %v194_v34 = vpop.f32.mrb[0].mxu0 }
 0x15d   :  { %123 = vst.msk [vmem:[#allocation2 + $0x8] sm:$0xff] %vm121_vm4, %v194_v34  ;;  %v112_v35 = vpop.f32.mrb[1].mxu0 }
 0x15e   :  { %122 = vst.msk [vmem:[#allocation2] sm:$0xff] %vm121_vm4, %v112_v35 }
 0x15f   :  { %244 = shalt.err (!%p241_p4)
}
 0x160   :  { %s245_s20 = scalar_lea.hbm %s345_s2, 256 }
 0x161   :  { %p246_p5 = scmp.ne.s32.totalorder %s345_s2, %s245_s20  ;;  %p249_p6 = scmp.lt.u32.totalorder %s245_s20, %s345_s2 }
 0x163   :  { %p251_p7 = pnand %p249_p6, %p246_p5 }
 0x165   :  { %254 = shalt.err (!%p251_p7)
}
 0x166   :  { %s260_s24 = smov 128   ;;  %s261_s25 = smov 8  }
 0x167   :  { %135 = dma.vmem_to_hbm [thread:$0]  %s130_s17, 256, %s345_s2, [#allocation3], %s260_s24, %s260_s24, %s261_s25  }
 0x168   :  { %255 = dma.done.wait [#allocation3], 256  }
 0x169   :  { %256 = vsyncadd [#allocation3], 4294967040 }
 0x16a   :  { %139 = vsyncpa [#allocation3], 1 }

</bundles_post_ra>
